<compile_context>
chip_gen: v5e
topology: v5e:2x2
jax: 0.10.0
libtpu: 0.0.40
codegen_flags: <defaults>
</compile_context>

<pallas_src>
import functools
import math

import jax
import jax.numpy as jnp
from jax.experimental import pallas as pl
from jax.experimental.pallas import tpu as pltpu


FUSED = 128  # actor-hidden(64) + critic-hidden(64) = one MXU lane tile


def _round_up(x, m):
    return (x + m - 1) // m * m


def actor_critic_kernel(x_ref, w_ref, bv_ref, out_ref, *, action_dim, k1):
    """Fused actor+critic forward + diagonal-Gaussian log-prob.

    x_ref:   (TB, K1)       bf16/f32  lanes [0:A)=action, [A:A+S)=state, rest 0
    w_ref:   (K1+256, 128)  bf16      [W1 | W2_blockdiag | W3_blockdiag] on rows
    bv_ref:  (4, 128)       f32       [b1 | b2 | b3 (c0 at lane A+1) | inv_var]
    out_ref: (TB, OUT_W)    f32       lanes [0:A)=mean, A=value, A+1=logp, rest 0
    """
    F = w_ref.shape[-1]
    out_w = out_ref.shape[-1]
    wdt = w_ref.dtype

    x = x_ref[...]                                   # already matmul dtype
    w1 = w_ref[0:k1, :]
    w2 = w_ref[k1:k1 + F, :]
    w3 = w_ref[k1 + F:k1 + 2 * F, :]
    b1 = bv_ref[0:1, :]
    b2 = bv_ref[1:2, :]
    b3 = bv_ref[2:3, :]

    # Both networks ride the same 128-lane matmuls (f32 accumulation on MXU).
    h = jnp.tanh(jnp.dot(x, w1, preferred_element_type=jnp.float32) + b1)
    h = jnp.tanh(jnp.dot(h.astype(wdt), w2, preferred_element_type=jnp.float32) + b2)
    z = jnp.dot(h.astype(wdt), w3, preferred_element_type=jnp.float32) + b3  # (TB, 128)

    # Only the first OUT_W lanes carry payload: [mean(A) | value | c0 | 0...].
    z8 = z[:, :out_w]
    lane = jax.lax.broadcasted_iota(jnp.int32, z8.shape, 1)
    mv = jnp.where(lane < action_dim, jnp.tanh(z8), z8)   # tanh only on mean lanes

    # Mahalanobis term: action lanes of x align with mean lanes of mv (both
    # start at lane 0); inv_var is zero outside [0:A) so state/value lanes drop.
    diff = x[:, :out_w].astype(jnp.float32) - mv
    inv_var = bv_ref[3:4, :out_w]
    maha = jnp.sum(diff * diff * inv_var, axis=-1, keepdims=True)   # (TB, 1)

    # lane A+1 holds c0 = -0.5*(k*ln(2*pi) + log|Sigma|); turn it into logp.
    out_ref[...] = jnp.where(lane == action_dim + 1, mv - 0.5 * maha, mv)


def pack_actor_critic_params(params, state_dim, action_dim, action_var,
                             param_dtype=jnp.bfloat16):
    """One-time packing of the 12 torch-style tensors into 2 lane-dense slabs."""
    (aw1, ab1, aw2, ab2, aw3, ab3,
     cw1, cb1, cw2, cb2, cw3, cb3) = params
    H = aw1.shape[1]
    F = 2 * H
    assert F == FUSED, "fused hidden width must be 128 (64 + 64)"
    A = action_dim
    assert A + 2 <= F

    out_w = _round_up(A + 2, 8)
    # bf16 sublane-aligned row offsets inside the weight slab, and wide enough
    # that the kernel may slice the first OUT_W input lanes.
    k1 = _round_up(max(A + state_dim, out_w), 16)

    # Layer-1 weights: rows [0:A) are zero so the action lanes don't feed the nets.
    w1 = jnp.zeros((k1, F), jnp.float32)
    w1 = w1.at[A:A + state_dim, :H].set(aw1).at[A:A + state_dim, H:].set(cw1)
    w2 = jnp.zeros((F, F), jnp.float32)
    w2 = w2.at[:H, :H].set(aw2).at[H:, H:].set(cw2)
    w3 = jnp.zeros((F, F), jnp.float32)
    w3 = w3.at[:H, :A].set(aw3)
    w3 = w3.at[H:, A].set(cw3[:, 0])
    w_slab = jnp.concatenate([w1, w2, w3], axis=0).astype(param_dtype)

    two_pi = 2.0 * math.pi
    log_det = jnp.sum(jnp.log(action_var))
    c0 = -0.5 * (A * math.log(two_pi) + log_det)
    entropy = 0.5 * A * (1.0 + math.log(two_pi)) + 0.5 * log_det

    b1 = jnp.zeros((F,), jnp.float32).at[:H].set(ab1).at[H:].set(cb1)
    b2 = jnp.zeros((F,), jnp.float32).at[:H].set(ab2).at[H:].set(cb2)
    b3 = jnp.zeros((F,), jnp.float32).at[:A].set(ab3)
    b3 = b3.at[A].set(cb3[0]).at[A + 1].set(c0)
    inv_var = jnp.zeros((F,), jnp.float32).at[:A].set(1.0 / action_var)
    bv_slab = jnp.stack([b1, b2, b3, inv_var], axis=0)   # (4, 128) f32

    return w_slab, bv_slab, entropy, k1, out_w


def actor_critic_evaluate(state, action, action_var, params, *,
                          batch_tile=1024, param_dtype=jnp.bfloat16,
                          buffer_count=None):
    """Continuous-action ActorCritic.evaluate(state, action).

    Returns (action_mean[B,A], action_logprobs[B], state_values[B,1], entropy[B]).
    """
    B, S = state.shape
    A = action.shape[-1]
    w_slab, bv_slab, ent_scalar, K1, OUT_W = pack_actor_critic_params(
        params, S, A, action_var, param_dtype)
    F = FUSED

    # Batch tile: big to amortize the ~0.35us per-step overhead, but halved
    # until the grid has >= 2 steps so both v7x TensorCores get work.
    TB = min(batch_tile, _round_up(B, 8))
    while TB > 8 and -(-B // TB) < 2:
        TB = max(8, _round_up(TB // 2, 8))
    B_pad = _round_up(B, TB)

    # Single streamed input slab at natural lane width (rounded to the bf16
    # sublane tile): lanes [0:A)=action, [A:A+S)=state, padded batch rows = 0.
    x_slab = jnp.zeros((B_pad, K1), param_dtype)
    x_slab = x_slab.at[:B, :A].set(action.astype(param_dtype))
    x_slab = x_slab.at[:B, A:A + S].set(state.astype(param_dtype))

    itemsize = x_slab.dtype.itemsize
    cost = pl.CostEstimate(
        flops=2 * B_pad * F * (K1 + 2 * F),
        transcendentals=B_pad * (2 * F + OUT_W),
        bytes_accessed=(B_pad * K1 * itemsize            # streamed input
                        + (K1 + 2 * F) * F * itemsize    # resident weight slab
                        + 4 * F * 4                      # bias / inv_var slab
                        + B_pad * OUT_W * 4))            # streamed output

    stream_kwargs = {}
    if buffer_count is not None:                          # optional deeper pipelining
        stream_kwargs["pipeline_mode"] = pl.Buffered(buffer_count)

    kernel = functools.partial(actor_critic_kernel, action_dim=A, k1=K1)
    out = pl.pallas_call(
        kernel,
        out_shape=jax.ShapeDtypeStruct((B_pad, OUT_W), jnp.float32),
        grid=(B_pad // TB,),
        in_specs=[
            pl.BlockSpec((TB, K1), lambda i: (i, 0), **stream_kwargs),   # input stream
            pl.BlockSpec((K1 + 2 * F, F), lambda i: (0, 0)),             # weights (resident)
            pl.BlockSpec((4, F), lambda i: (0, 0)),                      # biases + inv_var
        ],
        out_specs=pl.BlockSpec((TB, OUT_W), lambda i: (i, 0), **stream_kwargs),
        compiler_params=pltpu.CompilerParams(
            dimension_semantics=("parallel",)),
        cost_estimate=cost,
    )(x_slab, w_slab, bv_slab)

    mean = out[:B, :A]
    values = out[:B, A:A + 1]
    logp = out[:B, A + 1]
    entropy = jnp.broadcast_to(ent_scalar, (B,))   # batch-constant (shared covariance)
    return mean, logp, values, entropy


def init_linear(key, fan_in, fan_out):
    # PyTorch nn.Linear default init: U(-1/sqrt(fan_in), 1/sqrt(fan_in)).
    kw, kb = jax.random.split(key)
    bound = 1.0 / math.sqrt(fan_in)
    w = jax.random.uniform(kw, (fan_in, fan_out), jnp.float32, -bound, bound)
    b = jax.random.uniform(kb, (fan_out,), jnp.float32, -bound, bound)
    return w, b


def _ref_evaluate(state, action, action_var, params):
    """Pure-JAX f32 reference matching torch semantics (for a tolerance check)."""
    (aw1, ab1, aw2, ab2, aw3, ab3, cw1, cb1, cw2, cb2, cw3, cb3) = params
    h = jnp.tanh(state @ aw1 + ab1)
    h = jnp.tanh(h @ aw2 + ab2)
    mean = jnp.tanh(h @ aw3 + ab3)
    c = jnp.tanh(state @ cw1 + cb1)
    c = jnp.tanh(c @ cw2 + cb2)
    val = c @ cw3 + cb3
    k = action.shape[-1]
    diff = action - mean
    log_det = jnp.sum(jnp.log(action_var))
    maha = jnp.sum(diff * diff / action_var, axis=-1)
    logp = -0.5 * (k * math.log(2.0 * math.pi) + log_det + maha)
    ent = 0.5 * k * (1.0 + math.log(2.0 * math.pi)) + 0.5 * log_det
    return mean, logp, val, jnp.broadcast_to(ent, (state.shape[0],))


if __name__ == "__main__":
    B, STATE_DIM, ACTION_DIM = 8, 32, 4
    HIDDEN = 64
    action_std_init = 0.6

    key = jax.random.PRNGKey(0)
    keys = jax.random.split(key, 8)

    # actor: state_dim -> 64 -> 64 -> action_dim ; critic: state_dim -> 64 -> 64 -> 1
    aw1, ab1 = init_linear(keys[0], STATE_DIM, HIDDEN)
    aw2, ab2 = init_linear(keys[1], HIDDEN, HIDDEN)
    aw3, ab3 = init_linear(keys[2], HIDDEN, ACTION_DIM)
    cw1, cb1 = init_linear(keys[3], STATE_DIM, HIDDEN)
    cw2, cb2 = init_linear(keys[4], HIDDEN, HIDDEN)
    cw3, cb3 = init_linear(keys[5], HIDDEN, 1)
    params = (aw1, ab1, aw2, ab2, aw3, ab3, cw1, cb1, cw2, cb2, cw3, cb3)

    state = jax.random.normal(keys[6], (B, STATE_DIM), jnp.float32)
    action = jax.random.normal(keys[7], (B, ACTION_DIM), jnp.float32)
    action_var = jnp.full((ACTION_DIM,), action_std_init * action_std_init,
                          jnp.float32)

    # TODO(synk): act()'s dist.sample() (stateful torch RNG) and the discrete
    # Categorical/Softmax head are not reproduced; only the deterministic
    # continuous evaluate() path runs in-kernel.
    mean, logp, values, entropy = actor_critic_evaluate(
        state, action, action_var, params)
    jax.block_until_ready((mean, logp, values, entropy))

    r_mean, r_logp, r_val, r_ent = _ref_evaluate(state, action, action_var, params)

    assert mean.shape == (B, ACTION_DIM)
    assert logp.shape == (B,)
    assert values.shape == (B, 1)
    assert entropy.shape == (B,)
    assert bool(jnp.all(jnp.isfinite(mean)))
    assert bool(jnp.all(jnp.isfinite(logp)))
    assert bool(jnp.all(jnp.isfinite(values)))
    assert bool(jnp.all(jnp.isfinite(entropy)))
    # bf16 weights AND bf16 streamed state/action -> loose-but-safe tolerances
    # vs the f32 reference (logp amplifies quantization via 1/var = 2.78).
    assert bool(jnp.allclose(mean, r_mean, atol=1e-1, rtol=1e-1))
    assert bool(jnp.allclose(values, r_val, atol=1e-1, rtol=1e-1))
    assert bool(jnp.allclose(logp, r_logp, atol=7e-1, rtol=1e-1))
    assert bool(jnp.allclose(entropy, r_ent, atol=1e-3))

    print("KERNEL_OK")
</pallas_src>

<mosaic_0001>
module attributes {stable_mosaic.version = 11 : i64} {
  func.func @actor_critic_kernel(%arg0: i32, %arg1: memref<8x48xbf16, #tpu.memory_space<vmem>>, %arg2: memref<304x128xbf16, #tpu.memory_space<vmem>>, %arg3: memref<4x128xf32, #tpu.memory_space<vmem>>, %arg4: memref<8x8xf32, #tpu.memory_space<vmem>>) attributes {dimension_semantics = [#tpu.dimension_semantics<parallel>], iteration_bounds = array<i64: 1>, scalar_prefetch = 0 : i64, scratch_operands = 0 : i64, tpu.core_type = #tpu.core_type<tc>, window_params = [{transform_indices = @transform_0, window_bounds = array<i64: 8, 48>}, {pipeline_mode = #tpu.pipeline_mode<synchronous>, transform_indices = @transform_1, window_bounds = array<i64: 304, 128>}, {pipeline_mode = #tpu.pipeline_mode<synchronous>, transform_indices = @transform_2, window_bounds = array<i64: 4, 128>}, {transform_indices = @transform_3, window_bounds = array<i64: 8, 8>}]} {
    %c0 = arith.constant 0 : index
    %c0_0 = arith.constant 0 : index
    %0 = vector.load %arg1[%c0, %c0_0] : memref<8x48xbf16, #tpu.memory_space<vmem>>, vector<8x48xbf16>
    %c0_1 = arith.constant 0 : index
    %c0_2 = arith.constant 0 : index
    %1 = vector.load %arg2[%c0_1, %c0_2] : memref<304x128xbf16, #tpu.memory_space<vmem>>, vector<48x128xbf16>
    %c48 = arith.constant 48 : index
    %c0_3 = arith.constant 0 : index
    %2 = vector.load %arg2[%c48, %c0_3] : memref<304x128xbf16, #tpu.memory_space<vmem>>, vector<128x128xbf16>
    %c176 = arith.constant 176 : index
    %c0_4 = arith.constant 0 : index
    %3 = vector.load %arg2[%c176, %c0_4] : memref<304x128xbf16, #tpu.memory_space<vmem>>, vector<128x128xbf16>
    %c0_5 = arith.constant 0 : index
    %c0_6 = arith.constant 0 : index
    %4 = vector.load %arg3[%c0_5, %c0_6] : memref<4x128xf32, #tpu.memory_space<vmem>>, vector<1x128xf32>
    %c1 = arith.constant 1 : index
    %c0_7 = arith.constant 0 : index
    %5 = vector.load %arg3[%c1, %c0_7] : memref<4x128xf32, #tpu.memory_space<vmem>>, vector<1x128xf32>
    %c2 = arith.constant 2 : index
    %c0_8 = arith.constant 0 : index
    %6 = vector.load %arg3[%c2, %c0_8] : memref<4x128xf32, #tpu.memory_space<vmem>>, vector<1x128xf32>
    %cst = arith.constant dense<0.000000e+00> : vector<8x128xf32>
    %7 = tpu.matmul %0, %1, %cst {dimension_numbers = #tpu.dot_dimension_numbers<[1], [0], [0], [1], [0, 0, 1, 1], [], []>} : vector<8x48xbf16>, vector<48x128xbf16>, vector<8x128xf32> -> vector<8x128xf32>
    %8 = vector.broadcast %4 : vector<1x128xf32> to vector<8x128xf32>
    %9 = arith.addf %7, %8 : vector<8x128xf32>
    %10 = math.tanh %9 : vector<8x128xf32>
    %11 = arith.truncf %10 : vector<8x128xf32> to vector<8x128xbf16>
    %cst_9 = arith.constant dense<0.000000e+00> : vector<8x128xf32>
    %12 = tpu.matmul %11, %2, %cst_9 {dimension_numbers = #tpu.dot_dimension_numbers<[1], [0], [0], [1], [0, 0, 1, 1], [], []>} : vector<8x128xbf16>, vector<128x128xbf16>, vector<8x128xf32> -> vector<8x128xf32>
    %13 = vector.broadcast %5 : vector<1x128xf32> to vector<8x128xf32>
    %14 = arith.addf %12, %13 : vector<8x128xf32>
    %15 = math.tanh %14 : vector<8x128xf32>
    %16 = arith.truncf %15 : vector<8x128xf32> to vector<8x128xbf16>
    %cst_10 = arith.constant dense<0.000000e+00> : vector<8x128xf32>
    %17 = tpu.matmul %16, %3, %cst_10 {dimension_numbers = #tpu.dot_dimension_numbers<[1], [0], [0], [1], [0, 0, 1, 1], [], []>} : vector<8x128xbf16>, vector<128x128xbf16>, vector<8x128xf32> -> vector<8x128xf32>
    %18 = vector.broadcast %6 : vector<1x128xf32> to vector<8x128xf32>
    %19 = arith.addf %17, %18 : vector<8x128xf32>
    %20 = vector.extract_strided_slice %19 {offsets = [0, 0], sizes = [8, 8], strides = [1, 1]} : vector<8x128xf32> to vector<8x8xf32>
    %21 = tpu.iota {dimensions = array<i32: 1>} : vector<8x8xi32>
    %c4_i32 = arith.constant 4 : i32
    %22 = vector.broadcast %c4_i32 : i32 to vector<8x8xi32>
    %23 = arith.cmpi slt, %21, %22 : vector<8x8xi32>
    %24 = math.tanh %20 : vector<8x8xf32>
    %25 = arith.select %23, %24, %20 : vector<8x8xi1>, vector<8x8xf32>
    %26 = vector.extract_strided_slice %0 {offsets = [0, 0], sizes = [8, 8], strides = [1, 1]} : vector<8x48xbf16> to vector<8x8xbf16>
    %27 = arith.extf %26 : vector<8x8xbf16> to vector<8x8xf32>
    %28 = arith.subf %27, %25 : vector<8x8xf32>
    %c3 = arith.constant 3 : index
    %c0_11 = arith.constant 0 : index
    %29 = vector.load %arg3[%c3, %c0_11] : memref<4x128xf32, #tpu.memory_space<vmem>>, vector<1x8xf32>
    %30 = arith.mulf %28, %28 : vector<8x8xf32>
    %31 = vector.broadcast %29 : vector<1x8xf32> to vector<8x8xf32>
    %32 = arith.mulf %30, %31 : vector<8x8xf32>
    %cst_12 = arith.constant dense<0.000000e+00> : vector<8xf32>
    %33 = vector.multi_reduction <add>, %32, %cst_12 [1] : vector<8x8xf32> to vector<8xf32>
    %34 = vector.shape_cast %33 : vector<8xf32> to vector<8x1xf32>
    %c5_i32 = arith.constant 5 : i32
    %35 = vector.broadcast %c5_i32 : i32 to vector<8x8xi32>
    %36 = arith.cmpi eq, %21, %35 : vector<8x8xi32>
    %cst_13 = arith.constant 5.000000e-01 : f32
    %37 = vector.broadcast %cst_13 : f32 to vector<8x1xf32>
    %38 = arith.mulf %37, %34 : vector<8x1xf32>
    %39 = vector.broadcast %38 : vector<8x1xf32> to vector<8x8xf32>
    %40 = arith.subf %25, %39 : vector<8x8xf32>
    %41 = arith.select %36, %40, %25 : vector<8x8xi1>, vector<8x8xf32>
    %c0_14 = arith.constant 0 : index
    %c0_15 = arith.constant 0 : index
    %42 = vector.load %arg4[%c0_14, %c0_15] : memref<8x8xf32, #tpu.memory_space<vmem>>, vector<8x8xf32>
    tpu.vector_store %arg4[%c0_14, %c0_15], %41 {strides = array<i32>} : memref<8x8xf32, #tpu.memory_space<vmem>>, vector<8x8xf32>,
    return
  }
  func.func @transform_0(%arg0: i32) -> (i32, i32) {
    %c0_i32 = arith.constant 0 : i32
    %c0_i32_0 = arith.constant 0 : i32
    return %arg0, %c0_i32 : i32, i32
  }
  func.func @transform_1(%arg0: i32) -> (i32, i32) {
    %c0_i32 = arith.constant 0 : i32
    %c0_i32_0 = arith.constant 0 : i32
    %c0_i32_1 = arith.constant 0 : i32
    return %c0_i32, %c0_i32_0 : i32, i32
  }
  func.func @transform_2(%arg0: i32) -> (i32, i32) {
    %c0_i32 = arith.constant 0 : i32
    %c0_i32_0 = arith.constant 0 : i32
    %c0_i32_1 = arith.constant 0 : i32
    return %c0_i32, %c0_i32_0 : i32, i32
  }
  func.func @transform_3(%arg0: i32) -> (i32, i32) {
    %c0_i32 = arith.constant 0 : i32
    %c0_i32_0 = arith.constant 0 : i32
    return %arg0, %c0_i32 : i32, i32
  }
}

</mosaic_0001>

<bundles_post_ra>
// kernel: tpu_custom_call.1
= control target key start
LH: loop header
LB: loop body
LE: loop exit
PB: predicated region body
PF: predicated region fallthrough
CT: control target
= control target key end

     0   :  { %8 = vsyncpa [#allocation3], 0  ;;  %s555_s0 = inlined_call_operand.hbm [shape: bf16[8,48], index: 0, kind: input, shape index: {}]   ;;  %s556_s1 = inlined_call_operand.hbm [shape: bf16[304,128], index: 1, kind: input, shape index: {}]   ;;  %s557_s2 = inlined_call_operand.hbm [shape: f32[4,128], index: 2, kind: input, shape index: {}]   ;;  %s558_s3 = inlined_call_operand.hbm [shape: f32[8,8], index: 3, kind: output, shape index: {}]  }
   0x1   :  { %9 = vsyncpa [#allocation6], 0  ;;  %s26_s14 = sshll.u32 %s556_s1, 4  ;;  %s27_s14 = int_to_ptr.hbm [resolvable:$true] %s26_s14 }
   0x2   :  { %10 = vsyncpa [#allocation4], 0  ;;  %s517_s15 = smov [#allocation5]   ;;  %s16_s19 = sshll.u32 %s555_s0, 4  ;;  %s17_s19 = int_to_ptr.hbm [resolvable:$true] %s16_s19 }
   0x3   :  { %s28_s16 = sshll.u32 %s517_s15, 4  ;;  %s518_s20 = smov 64   ;;  %s29_s16 = int_to_ptr.vmem [resolvable:$true] %s28_s16 }
   0x4   :  { %s519_s21 = smov 4   ;;  %s520_s22 = smov [#allocation2]  }
   0x5   :  { %34 = dma.hbm_to_vmem [thread:$0]  %s27_s14, 2432, %s29_s16, [#allocation6], %s518_s20, %s518_s20, %s519_s21  }
   0x6   :  { %s18_s23 = sshll.u32 %s520_s22, 4  ;;  %s40_s26 = sshll.u32 %s557_s2, 4  ;;  %s19_s23 = int_to_ptr.vmem [resolvable:$true] %s18_s23  ;;  %s41_s26 = int_to_ptr.hbm [resolvable:$true] %s40_s26 }
   0x7   :  { %21 = dma.hbm_to_vmem [thread:$0]  %s17_s19, 64, %s19_s23, [#allocation3]  }
   0x8   :  { %s521_s1 = smov [#allocation7]  }
   0x9   :  { %s42_s27 = sshll.u32 %s521_s1, 4  ;;  %s43_s27 = int_to_ptr.vmem [resolvable:$true] %s42_s27 }
   0xa   :  { %45 = dma.hbm_to_vmem [thread:$0]  %s41_s26, 64, %s43_s27, [#allocation6]  }
   0xb   :  { %511 = dma.done.wait [#allocation3], 64  }
   0xc   :  { %512 = vsyncadd [#allocation3], 4294967232 }
   0xd   :  { %513 = dma.done.wait [#allocation6], 2496  }
   0xe   :  { %514 = vsyncadd [#allocation6], 4294964800  ;;  %v382_v0 = vld [vmem:[#allocation5 + $0x10] sm:$0xff]  ;;  %v381_v2 = vld [vmem:[#allocation5 + $0x8] sm:$0xff]  ;;  %vm120_vm0 = vcmask 392192   ;;  %v265_v33 = vlaneseq  ;;  %vm276_vm2 = vcmask 64512  }
   0xf   :  { %v390_v1 = vld [vmem:[#allocation5 + $0x50] sm:$0xff]  ;;  %129 = vmatpush.bf16.msra.mxu0 %v382_v0  ;;  %v389_v3 = vld [vmem:[#allocation5 + $0x48] sm:$0xff]  ;;  %v380_v4 = vld [vmem:[#allocation5] sm:$0xff]  ;;  %s522_s0 = smov [#allocation8]   ;;  %s292_s30 = sshll.u32 %s558_s3, 4  ;;  %s293_s30 = int_to_ptr.hbm [resolvable:$true] %s292_s30 }
  0x10   :  { %188 = vmatpush.bf16.msra.mxu1 %v390_v1  ;;  %v388_v5 = vld [vmem:[#allocation5 + $0x40] sm:$0xff]  ;;  %v59_v6 = vld [vmem:[#allocation2] sm:$0xf]  ;;  %v386_v8 = vld [vmem:[#allocation5 + $0x30] sm:$0xff]  ;;  %v266_v36 = vand.u32 127, %v265_v33  ;;  %s290_s2 = sshll.u32 %s522_s0, 4  ;;  %s291_s2 = int_to_ptr.vmem [resolvable:$true] %s290_s2 }
  0x11   :  { %v387_v7 = vld [vmem:[#allocation5 + $0x38] sm:$0xff]  ;;  %v385_v9 = vld [vmem:[#allocation5 + $0x28] sm:$0xff]  ;;  %v384_v10 = vld [vmem:[#allocation5 + $0x20] sm:$0xff]  ;;  %v270_v37 = vunpack.c.l.bf16 %v59_v6 }
  0x12   :  { %v383_v11 = vld [vmem:[#allocation5 + $0x18] sm:$0xff]  ;;  %v398_v12 = vld [vmem:[#allocation5 + $0x90] sm:$0xff]  ;;  %v397_v13 = vld [vmem:[#allocation5 + $0x88] sm:$0xff]  ;;  %vm267_vm1 = vcmp.lt.s32.totalorder %v266_v36, 4  ;;  %vm280_vm3 = vcmp.eq.s32.totalorder %v266_v36, 5 }
  0x13   :  { %130 = vmatpush.bf16.msra.mxu0 %v381_v2  ;;  %252 = vmatpush.bf16.msra.mxu2 %v398_v12  ;;  %v396_v14 = vld [vmem:[#allocation5 + $0x80] sm:$0xff]  ;;  %v395_v15 = vld [vmem:[#allocation5 + $0x78] sm:$0xff]  ;;  %v394_v16 = vld [vmem:[#allocation5 + $0x70] sm:$0xff] }
  0x14   :  { %189 = vmatpush.bf16.msra.mxu1 %v389_v3  ;;  %v405_v17 = vld [vmem:[#allocation7] ss:$0 sm:$0xff]  ;;  %v393_v23 = vld [vmem:[#allocation5 + $0x68] sm:$0xff]  ;;  %v392_v24 = vld [vmem:[#allocation5 + $0x60] sm:$0xff] }
  0x15   :  { %v391_v25 = vld [vmem:[#allocation5 + $0x58] sm:$0xff] }
  0x16   :  { %v406_v26 = vld [vmem:[#allocation7 + $0x1] ss:$0 sm:$0xff]  ;;  %v407_v32 = vld [vmem:[#allocation7 + $0x2] ss:$0 sm:$0xff]  ;;  %v408_v42 = vld [vmem:[#allocation7 + $0x3] ss:$0 sm:$0xff] }
  0x17   :  { %131 = vmatpush.bf16.msra.mxu0 %v380_v4  ;;  %253 = vmatpush.bf16.msra.mxu2 %v397_v13 }
  0x18   :  { %190 = vmatpush.bf16.msra.mxu1 %v388_v5 }
  0x1a   :  { %315 = vmatmul.msk.bf16.vlgmr.msra.gmra.mxu0 %vm120_vm0, %v59_v6 }
  0x1b   :  { %254 = vmatpush.bf16.msra.mxu2 %v396_v14 }
  0x1c   :  { %191 = vmatpush.bf16.msra.mxu1 %v387_v7 }
  0x1f   :  { %255 = vmatpush.bf16.msra.mxu2 %v395_v15 }
  0x20   :  { %192 = vmatpush.bf16.msra.mxu1 %v386_v8 }
  0x23   :  { %256 = vmatpush.bf16.msra.mxu2 %v394_v16 }
  0x24   :  { %193 = vmatpush.bf16.msra.mxu1 %v385_v9 }
  0x27   :  { %257 = vmatpush.bf16.msra.mxu2 %v393_v23 }
  0x28   :  { %194 = vmatpush.bf16.msra.mxu1 %v384_v10 }
  0x2b   :  { %258 = vmatpush.bf16.msra.mxu2 %v392_v24 }
  0x2c   :  { %195 = vmatpush.bf16.msra.mxu1 %v383_v11 }
  0x2f   :  { %259 = vmatpush.bf16.msra.mxu2 %v391_v25 }
  0x97   :  { %v133_v18 = vpop.f32.mrf.mxu0 }
  0x98   :  { %v134_v19 = vadd.f32 %v405_v17, %v133_v18 }
  0x9a   :  { %409 = vtanh.f32 %v134_v19 }
  0x9f   :  { %v135_v20 = vpop.f32.mrf.mxu0 }
  0xa0   :  { %v410_v21 = vpop.eup %409 }
  0xa1   :  { %v138_v22 = vpack.c.bf16 %v410_v21, %v410_v21 }
  0xa3   :  { %196 = vmatmul.bf16.vlgmr.msra.gmra.mxu1 %v138_v22 }
 0x120   :  { %v197_v27 = vpop.f32.mrf.mxu1 }
 0x121   :  { %v198_v28 = vadd.f32 %v406_v26, %v197_v27 }
 0x123   :  { %411 = vtanh.f32 %v198_v28 }
 0x128   :  { %v199_v29 = vpop.f32.mrf.mxu1 }
 0x129   :  { %v412_v30 = vpop.eup %411 }
 0x12a   :  { %v202_v31 = vpack.c.bf16 %v412_v30, %v412_v30 }
 0x12c   :  { %260 = vmatmul.bf16.vlgmr.msra.gmra.mxu2 %v202_v31 }
 0x1af   :  { %v261_v34 = vpop.f32.mrf.mxu2 }
 0x1b0   :  { %v262_v35 = vadd.f32 %v407_v32, %v261_v34 }
 0x1b2   :  { %413 = vtanh.f32 %v262_v35 }
 0x1b7   :  { %v263_v38 = vpop.f32.mrf.mxu2 }
 0x1b8   :  { %v414_v39 = vpop.eup %413 }
 0x1b9   :  { %v269_v40 = vsel %vm267_vm1, %v414_v39, %v262_v35 }
 0x1ba   :  { %v271_v41 = vsub.f32 %v270_v37, %v269_v40 }
 0x1bc   :  { %v273_v43 = vmul.f32 %v271_v41, %v271_v41 }
 0x1be   :  { %v275_v44 = vmul.f32 %v408_v42, %v273_v43 }
 0x1c0   :  { %v277_v45 = vsel %vm276_vm2, %v275_v44, 0.0 }
 0x1c1   :  { %278 = vadd.xlane.f32.xlu0 %v277_v45 }
 0x234   :  { %v279_v46 = vpop.xlane.xlu0 %278 }
 0x235   :  { %v281_v47 = vmul.f32 0.5, %v279_v46 }
 0x237   :  { %v282_v48 = vsub.f32 %v269_v40, %v281_v47 }
 0x239   :  { %v283_v49 = vsel %vm280_vm3, %v282_v48, %v269_v40 }
 0x23a   :  { %284 = vst.msk [vmem:[#allocation8] sm:$0xff] %vm276_vm2, %v283_v49 }
 0x23b   :  { %295 = dma.vmem_to_hbm [thread:$0]  %s291_s2, 128, %s293_s30, [#allocation4]  }
 0x23c   :  { %515 = dma.done.wait [#allocation4], 128  }
 0x23d   :  { %516 = vsyncadd [#allocation4], 4294967168 }
 0x23e   :  { %300 = vsyncpa [#allocation3], 1 }
 0x23f   :  { %301 = vsyncpa [#allocation6], 1 }
 0x240   :  { %302 = vsyncpa [#allocation4], 1 }

</bundles_post_ra>
